<compile_context>
chip_gen: v6e
topology: v6e:2x2x1
jax: 0.10.0
libtpu: 0.0.40
codegen_flags: <defaults>
</compile_context>

<pallas_src>
import functools

import jax
import jax.numpy as jnp
import numpy as np
from jax.experimental import pallas as pl
from jax.experimental.pallas import tpu as pltpu

FC1 = 256
FC2 = 256
LANE = 128
SUBLANE = 8
TB_MAX = 512          # batch tile; >=256 keeps the MXU busy on v6e/v7x, 4x128 on v5e
NEG_BIG = -1.0e30     # "minus infinity" for padded action lanes (finite -> no NaNs)


def _round_up(v, m):
    return (v + m - 1) // m * m


def _actor_kernel(x_ref, w1_ref, b1_ref, w2_ref, b2_ref, wp_ref, bp_ref, pi_ref):
    """One batch tile: fc1+relu, fc2+relu, fc_policy+softmax (padded lanes -> 0)."""
    x = x_ref[...].astype(jnp.bfloat16)                       # [TB, S]

    # fc1 + relu   (bf16 MXU inputs, f32 accumulation)
    h1 = jnp.dot(x, w1_ref[...], preferred_element_type=jnp.float32)
    h1 = jnp.maximum(h1 + b1_ref[...], 0.0)                   # [TB, FC1] f32

    # fc2 + relu
    h2 = jnp.dot(h1.astype(jnp.bfloat16), w2_ref[...],
                 preferred_element_type=jnp.float32)
    h2 = jnp.maximum(h2 + b2_ref[...], 0.0)                   # [TB, FC2] f32

    # fc_policy + softmax over actions (padded lanes carry bias = -1e30 -> exp 0)
    logits = jnp.dot(h2.astype(jnp.bfloat16), wp_ref[...],
                     preferred_element_type=jnp.float32)
    logits = logits + bp_ref[...]                             # [TB, A_pad] f32
    m = jnp.max(logits, axis=1, keepdims=True)
    e = jnp.exp(logits - m)
    denom = jnp.sum(e, axis=1, keepdims=True)
    pi_ref[...] = (e * pl.reciprocal(denom, approx=True)).astype(pi_ref.dtype)


def actor_forward(x, w1, b1, w2, b2, wp, bp, action_space):
    """x: [B, state_dim] f32. Weights are [in, out] (bf16); action dim padded."""
    B, S = x.shape
    A_pad = wp.shape[1]

    # Batch tile: multiple of 8 sublanes, capped at TB_MAX; pad B to a multiple.
    TB = min(TB_MAX, _round_up(B, SUBLANE))
    B_pad = _round_up(B, TB)
    if B_pad != B:
        x = jnp.pad(x, ((0, B_pad - B), (0, 0)))
    grid = (B_pad // TB,)

    # Weights/biases: full-array blocks with constant index maps -> fetched once,
    # resident in VMEM across all batch tiles.
    def const_spec(arr):
        return pl.BlockSpec(arr.shape, lambda i: (0, 0))

    in_specs = [
        pl.BlockSpec((TB, S), lambda i: (i, 0)),    # x: tiled over batch
        const_spec(w1), const_spec(b1),
        const_spec(w2), const_spec(b2),
        const_spec(wp), const_spec(bp),
    ]
    out_specs = pl.BlockSpec((TB, A_pad), lambda i: (i, 0))

    flops = 2 * B_pad * (S * FC1 + FC1 * FC2 + FC2 * A_pad)
    bytes_accessed = (
        B_pad * S * 4                                   # x (f32)
        + (S * FC1 + FC1 * FC2 + FC2 * A_pad) * 2       # bf16 weights
        + (FC1 + FC2 + A_pad) * 4                       # f32 biases
        + B_pad * A_pad * 4                             # pi (f32)
    )
    cost = pl.CostEstimate(
        flops=flops,
        transcendentals=B_pad * A_pad + B_pad,          # exp + reciprocal
        bytes_accessed=bytes_accessed,
    )

    pi_pad = pl.pallas_call(
        _actor_kernel,
        out_shape=jax.ShapeDtypeStruct((B_pad, A_pad), jnp.float32),
        grid=grid,
        in_specs=in_specs,
        out_specs=out_specs,
        compiler_params=pltpu.CompilerParams(
            dimension_semantics=("parallel",),          # v7x: shard batch across 2 TCs
        ),
        cost_estimate=cost,
    )(x, w1, b1, w2, b2, wp, bp)

    return pi_pad[:B, :action_space]


def _orthogonal(key, shape, gain):
    """Deterministic orthogonal init (same semantics as torch orthogonal_)."""
    rows, cols = shape
    n = max(rows, cols)
    a = jax.random.normal(key, (n, n), dtype=jnp.float32)
    q, r = jnp.linalg.qr(a)
    q = q * jnp.sign(jnp.diag(r))        # sign convention, as torch does
    return gain * q[:rows, :cols]


def make_actor_params(state_dim, action_space, fc1_unit=FC1, fc2_unit=FC2,
                      init_weight_gain=np.sqrt(2), init_policy_weight_gain=0.01,
                      init_bias=0.0):
    """Weights stored [in, out] in bf16 (MXU inputs); biases f32.

    Policy weight/bias are padded along the action dim to a lane-dense 128:
    padded weight columns are 0 and padded bias entries are -1e30 so the padded
    logit lanes vanish in the softmax.
    """
    k1, k2, k3 = jax.random.split(jax.random.PRNGKey(0), 3)
    a_pad = _round_up(action_space, LANE)

    w1 = _orthogonal(k1, (state_dim, fc1_unit), init_weight_gain).astype(jnp.bfloat16)
    w2 = _orthogonal(k2, (fc1_unit, fc2_unit), init_weight_gain).astype(jnp.bfloat16)

    wp_real = _orthogonal(k3, (fc2_unit, action_space), init_policy_weight_gain)
    wp = jnp.zeros((fc2_unit, a_pad), jnp.float32).at[:, :action_space].set(wp_real)
    wp = wp.astype(jnp.bfloat16)

    b1 = jnp.full((1, fc1_unit), init_bias, dtype=jnp.float32)
    b2 = jnp.full((1, fc2_unit), init_bias, dtype=jnp.float32)
    bp = jnp.full((1, a_pad), NEG_BIG, dtype=jnp.float32)
    bp = bp.at[:, :action_space].set(init_bias)
    return w1, b1, w2, b2, wp, bp


if __name__ == "__main__":
    # Small shapes consistent with the module: batch=2 states of dim 4, 6 actions.
    batch, state_dim, action_space = 2, 4, 6

    params = make_actor_params(state_dim, action_space)
    x = jax.random.normal(jax.random.PRNGKey(0), (batch, state_dim), dtype=jnp.float32)

    pi = actor_forward(x, *params, action_space=action_space)
    pi = jax.block_until_ready(pi)

    # Sanity: correct shape, softmax rows ~ sum to 1 (approx reciprocal tolerance).
    assert pi.shape == (batch, action_space)
    assert jnp.allclose(jnp.sum(pi, axis=1), 1.0, atol=1e-2)

    # Cross-check against a pure-JAX reference using the same bf16/f32 mixed path.
    w1, b1, w2, b2, wp, bp = params
    xb = x.astype(jnp.bfloat16)
    h1 = jnp.maximum(jnp.dot(xb, w1, preferred_element_type=jnp.float32) + b1, 0.0)
    h2 = jnp.maximum(
        jnp.dot(h1.astype(jnp.bfloat16), w2, preferred_element_type=jnp.float32) + b2,
        0.0)
    logits = jnp.dot(h2.astype(jnp.bfloat16), wp,
                     preferred_element_type=jnp.float32) + bp
    ref = jax.nn.softmax(logits, axis=1)[:, :action_space]
    assert jnp.allclose(pi, ref, atol=1e-2), "mismatch vs reference"

    print("KERNEL_OK")
</pallas_src>

<mosaic_0001>
module attributes {stable_mosaic.version = 11 : i64} {
  func.func @_actor_kernel(%arg0: i32, %arg1: memref<8x4xf32, #tpu.memory_space<vmem>>, %arg2: memref<4x256xbf16, #tpu.memory_space<vmem>>, %arg3: memref<1x256xf32, #tpu.memory_space<vmem>>, %arg4: memref<256x256xbf16, #tpu.memory_space<vmem>>, %arg5: memref<1x256xf32, #tpu.memory_space<vmem>>, %arg6: memref<256x128xbf16, #tpu.memory_space<vmem>>, %arg7: memref<1x128xf32, #tpu.memory_space<vmem>>, %arg8: memref<8x128xf32, #tpu.memory_space<vmem>>) attributes {dimension_semantics = [#tpu.dimension_semantics<parallel>], iteration_bounds = array<i64: 1>, scalar_prefetch = 0 : i64, scratch_operands = 0 : i64, tpu.core_type = #tpu.core_type<tc>, window_params = [{transform_indices = @transform_0, window_bounds = array<i64: 8, 4>}, {pipeline_mode = #tpu.pipeline_mode<synchronous>, transform_indices = @transform_1, window_bounds = array<i64: 4, 256>}, {pipeline_mode = #tpu.pipeline_mode<synchronous>, transform_indices = @transform_2, window_bounds = array<i64: 1, 256>}, {pipeline_mode = #tpu.pipeline_mode<synchronous>, transform_indices = @transform_3, window_bounds = array<i64: 256, 256>}, {pipeline_mode = #tpu.pipeline_mode<synchronous>, transform_indices = @transform_4, window_bounds = array<i64: 1, 256>}, {pipeline_mode = #tpu.pipeline_mode<synchronous>, transform_indices = @transform_5, window_bounds = array<i64: 256, 128>}, {pipeline_mode = #tpu.pipeline_mode<synchronous>, transform_indices = @transform_6, window_bounds = array<i64: 1, 128>}, {transform_indices = @transform_7, window_bounds = array<i64: 8, 128>}]} {
    %c0 = arith.constant 0 : index
    %c0_0 = arith.constant 0 : index
    %0 = vector.load %arg1[%c0, %c0_0] : memref<8x4xf32, #tpu.memory_space<vmem>>, vector<8x4xf32>
    %1 = arith.truncf %0 : vector<8x4xf32> to vector<8x4xbf16>
    %c0_1 = arith.constant 0 : index
    %c0_2 = arith.constant 0 : index
    %2 = vector.load %arg2[%c0_1, %c0_2] : memref<4x256xbf16, #tpu.memory_space<vmem>>, vector<4x256xbf16>
    %cst = arith.constant dense<0.000000e+00> : vector<8x256xf32>
    %3 = tpu.matmul %1, %2, %cst {dimension_numbers = #tpu.dot_dimension_numbers<[1], [0], [0], [1], [0, 0, 1, 1], [], []>} : vector<8x4xbf16>, vector<4x256xbf16>, vector<8x256xf32> -> vector<8x256xf32>
    %c0_3 = arith.constant 0 : index
    %c0_4 = arith.constant 0 : index
    %4 = vector.load %arg3[%c0_3, %c0_4] : memref<1x256xf32, #tpu.memory_space<vmem>>, vector<1x256xf32>
    %5 = vector.broadcast %4 : vector<1x256xf32> to vector<8x256xf32>
    %6 = arith.addf %3, %5 : vector<8x256xf32>
    %cst_5 = arith.constant 0.000000e+00 : f32
    %7 = vector.broadcast %cst_5 : f32 to vector<8x256xf32>
    %8 = arith.maximumf %6, %7 : vector<8x256xf32>
    %9 = arith.truncf %8 : vector<8x256xf32> to vector<8x256xbf16>
    %c0_6 = arith.constant 0 : index
    %c0_7 = arith.constant 0 : index
    %10 = vector.load %arg4[%c0_6, %c0_7] : memref<256x256xbf16, #tpu.memory_space<vmem>>, vector<256x256xbf16>
    %cst_8 = arith.constant dense<0.000000e+00> : vector<8x256xf32>
    %11 = tpu.matmul %9, %10, %cst_8 {dimension_numbers = #tpu.dot_dimension_numbers<[1], [0], [0], [1], [0, 0, 1, 1], [], []>} : vector<8x256xbf16>, vector<256x256xbf16>, vector<8x256xf32> -> vector<8x256xf32>
    %c0_9 = arith.constant 0 : index
    %c0_10 = arith.constant 0 : index
    %12 = vector.load %arg5[%c0_9, %c0_10] : memref<1x256xf32, #tpu.memory_space<vmem>>, vector<1x256xf32>
    %13 = vector.broadcast %12 : vector<1x256xf32> to vector<8x256xf32>
    %14 = arith.addf %11, %13 : vector<8x256xf32>
    %cst_11 = arith.constant 0.000000e+00 : f32
    %15 = vector.broadcast %cst_11 : f32 to vector<8x256xf32>
    %16 = arith.maximumf %14, %15 : vector<8x256xf32>
    %17 = arith.truncf %16 : vector<8x256xf32> to vector<8x256xbf16>
    %c0_12 = arith.constant 0 : index
    %c0_13 = arith.constant 0 : index
    %18 = vector.load %arg6[%c0_12, %c0_13] : memref<256x128xbf16, #tpu.memory_space<vmem>>, vector<256x128xbf16>
    %cst_14 = arith.constant dense<0.000000e+00> : vector<8x128xf32>
    %19 = tpu.matmul %17, %18, %cst_14 {dimension_numbers = #tpu.dot_dimension_numbers<[1], [0], [0], [1], [0, 0, 1, 1], [], []>} : vector<8x256xbf16>, vector<256x128xbf16>, vector<8x128xf32> -> vector<8x128xf32>
    %c0_15 = arith.constant 0 : index
    %c0_16 = arith.constant 0 : index
    %20 = vector.load %arg7[%c0_15, %c0_16] : memref<1x128xf32, #tpu.memory_space<vmem>>, vector<1x128xf32>
    %21 = vector.broadcast %20 : vector<1x128xf32> to vector<8x128xf32>
    %22 = arith.addf %19, %21 : vector<8x128xf32>
    %cst_17 = arith.constant dense<0xFF800000> : vector<8xf32>
    %23 = vector.multi_reduction <maximumf>, %22, %cst_17 [1] : vector<8x128xf32> to vector<8xf32>
    %24 = vector.shape_cast %23 : vector<8xf32> to vector<8x1xf32>
    %25 = vector.broadcast %24 : vector<8x1xf32> to vector<8x128xf32>
    %26 = arith.subf %22, %25 : vector<8x128xf32>
    %27 = math.exp %26 : vector<8x128xf32>
    %cst_18 = arith.constant dense<0.000000e+00> : vector<8xf32>
    %28 = vector.multi_reduction <add>, %27, %cst_18 [1] : vector<8x128xf32> to vector<8xf32>
    %29 = vector.shape_cast %28 : vector<8xf32> to vector<8x1xf32>
    %30 = tpu.reciprocal %29 {approx = true} : vector<8x1xf32> -> vector<8x1xf32>
    %31 = vector.broadcast %30 : vector<8x1xf32> to vector<8x128xf32>
    %32 = arith.mulf %27, %31 : vector<8x128xf32>
    %c0_19 = arith.constant 0 : index
    %c0_20 = arith.constant 0 : index
    %33 = vector.load %arg8[%c0_19, %c0_20] : memref<8x128xf32, #tpu.memory_space<vmem>>, vector<8x128xf32>
    tpu.vector_store %arg8[%c0_19, %c0_20], %32 {strides = array<i32>} : memref<8x128xf32, #tpu.memory_space<vmem>>, vector<8x128xf32>,
    return
  }
  func.func @transform_0(%arg0: i32) -> (i32, i32) {
    %c0_i32 = arith.constant 0 : i32
    %c0_i32_0 = arith.constant 0 : i32
    return %arg0, %c0_i32 : i32, i32
  }
  func.func @transform_1(%arg0: i32) -> (i32, i32) {
    %c0_i32 = arith.constant 0 : i32
    %c0_i32_0 = arith.constant 0 : i32
    %c0_i32_1 = arith.constant 0 : i32
    return %c0_i32, %c0_i32_0 : i32, i32
  }
  func.func @transform_2(%arg0: i32) -> (i32, i32) {
    %c0_i32 = arith.constant 0 : i32
    %c0_i32_0 = arith.constant 0 : i32
    %c0_i32_1 = arith.constant 0 : i32
    return %c0_i32, %c0_i32_0 : i32, i32
  }
  func.func @transform_3(%arg0: i32) -> (i32, i32) {
    %c0_i32 = arith.constant 0 : i32
    %c0_i32_0 = arith.constant 0 : i32
    %c0_i32_1 = arith.constant 0 : i32
    return %c0_i32, %c0_i32_0 : i32, i32
  }
  func.func @transform_4(%arg0: i32) -> (i32, i32) {
    %c0_i32 = arith.constant 0 : i32
    %c0_i32_0 = arith.constant 0 : i32
    %c0_i32_1 = arith.constant 0 : i32
    return %c0_i32, %c0_i32_0 : i32, i32
  }
  func.func @transform_5(%arg0: i32) -> (i32, i32) {
    %c0_i32 = arith.constant 0 : i32
    %c0_i32_0 = arith.constant 0 : i32
    %c0_i32_1 = arith.constant 0 : i32
    return %c0_i32, %c0_i32_0 : i32, i32
  }
  func.func @transform_6(%arg0: i32) -> (i32, i32) {
    %c0_i32 = arith.constant 0 : i32
    %c0_i32_0 = arith.constant 0 : i32
    %c0_i32_1 = arith.constant 0 : i32
    return %c0_i32, %c0_i32_0 : i32, i32
  }
  func.func @transform_7(%arg0: i32) -> (i32, i32) {
    %c0_i32 = arith.constant 0 : i32
    %c0_i32_0 = arith.constant 0 : i32
    return %arg0, %c0_i32 : i32, i32
  }
}

</mosaic_0001>

<bundles_post_ra>
// kernel: tpu_custom_call.1
= control target key start
LH: loop header
LB: loop body
LE: loop exit
PB: predicated region body
PF: predicated region fallthrough
CT: control target
= control target key end

     0   :  { %12 = vsyncpa [#allocation3], 0  ;;  %s874_s0 = inlined_call_operand.vmem [shape: f32[8,4], index: 0, kind: input, shape index: {}]   ;;  %s875_s1 = inlined_call_operand.vmem [shape: bf16[4,256], index: 1, kind: input, shape index: {}]   ;;  %s876_s2 = inlined_call_operand.vmem [shape: f32[1,256], index: 2, kind: input, shape index: {}]   ;;  %s877_s3 = inlined_call_operand.hbm [shape: bf16[256,256], index: 3, kind: input, shape index: {}]   ;;  %s878_s4 = inlined_call_operand.vmem [shape: f32[1,256], index: 4, kind: input, shape index: {}]   ;;  %s879_s5 = inlined_call_operand.hbm [shape: bf16[256,128], index: 5, kind: input, shape index: {}]   ;;  %s880_s6 = inlined_call_operand.vmem [shape: f32[1,128], index: 6, kind: input, shape index: {}]   ;;  %s881_s7 = inlined_call_operand.hbm [shape: f32[8,128], index: 7, kind: output, shape index: {}]  }
   0x1   :  { %13 = vsyncpa [#allocation6], 0 }
   0x2   :  { %14 = vsyncpa [#allocation4], 0  ;;  %s802_s24 = smov [#allocation2]  }
   0x3   :  { %s26_s25 = sshll.u32 %s802_s24, 4  ;;  %s27_s25 = int_to_ptr.vmem [resolvable:$true] %s26_s25 }
   0x4   :  { %s744_s26 = scalar_lea.vmem %s27_s25, 4096  ;;  %p749_p1 = scmp.lt.s32.totalorder %s27_s25, %s27_s25 }
   0x5   :  { %p745_p0 = scmp.ne.s32.totalorder %s27_s25, %s744_s26  ;;  %p750_p2 = scmp.lt.s32.totalorder %s744_s26, %s744_s26 }
   0x7   :  { %p751_p3 = por %p750_p2, %p749_p1 }
   0x9   :  { %p752_p4 = pnand %p751_p3, %p745_p0 }
   0xb   :  { %755 = shalt.err (!%p752_p4)
}
   0xc   :  { %s803_s27 = smov 128   ;;  %s804_s28 = smov 8  }
   0xd   :  { %32 = dma.hbm_to_vmem [thread:$0]  %s877_s3, 4096, %s27_s25, [#allocation3], %s803_s27, %s803_s27, %s804_s28  }
   0xe   :  { %s805_s8 = smov [#allocation5]  }
   0xf   :  { %s40_s9 = sshll.u32 %s805_s8, 4  ;;  %s41_s9 = int_to_ptr.vmem [resolvable:$true] %s40_s9 }
  0x10   :  { %s764_s10 = scalar_lea.vmem %s41_s9, 2048  ;;  %p769_p6 = scmp.lt.s32.totalorder %s41_s9, %s41_s9 }
  0x11   :  { %p765_p5 = scmp.ne.s32.totalorder %s41_s9, %s764_s10  ;;  %p770_p7 = scmp.lt.s32.totalorder %s764_s10, %s764_s10 }
  0x13   :  { %p771_p8 = por %p770_p7, %p769_p6 }
  0x15   :  { %p772_p9 = pnand %p771_p8, %p765_p5 }
  0x17   :  { %775 = shalt.err (!%p772_p9)
}
  0x18   :  { %s806_s11 = smov 64   ;;  %s807_s12 = smov 4  }
  0x19   :  { %46 = dma.hbm_to_vmem [thread:$0]  %s879_s5, 2048, %s41_s9, [#allocation6], %s806_s11, %s806_s11, %s807_s12  }
  0x1a   :  { %796 = dma.done.wait [#allocation3], 4096  }
  0x1b   :  { %797 = vsyncadd [#allocation3], 4294963200 }
  0x1c   :  { %798 = dma.done.wait [#allocation6], 2048  }
  0x1d   :  { %799 = vsyncadd [#allocation6], 4294965248  ;;  %v808_v0 = vmov 0   ;;  %vm84_vm0 = vcmask 1041408   ;;  %v56_v2 = vld [vmem:[%s874_s0] sm:$0xff]  ;;  %vm80_vm1 = vcmask 31744   ;;  %v61_v50 = vlaneseq }
  0x1e   :  { %123 = vmatprep.mubr.bf16.mxu0 %v808_v0  ;;  %v586_v1 = vld.sshfl [vmem:[%s875_s1] sm:$0x33 pattern:$0x76325410]  ;;  %v668_v5 = vld [vmem:[#allocation2 + $0x74] ss:$8 sps:$4 sm:$0xff]   ;;  %v57_v8 = vpack.c.bf16 %v56_v2, %v56_v2 }
  0x1f   :  { %v79_v3 = vcombine.high %v586_v1, %v586_v1  ;;  %v86_v4 = vsel %vm84_vm0, %v586_v1, 0  ;;  %v670_v6 = vld [vmem:[#allocation2 + $0x70] ss:$8 sps:$4 sm:$0xff]   ;;  %v671_v7 = vld [vmem:[#allocation2 + $0x64] ss:$8 sps:$4 sm:$0xff]   ;;  %340 = vmatprep.subr.bf16.mxu1 %v668_v5  ;;  %v62_v51 = vshrl.u32 %v61_v50, 7 }
  0x20   :  { %341 = vmatpush1.bf16.msra.mxu1 %v670_v6  ;;  %v673_v9 = vld [vmem:[#allocation2 + $0x60] ss:$8 sps:$4 sm:$0xff]   ;;  %v674_v10 = vld [vmem:[#allocation2 + $0x54] ss:$8 sps:$4 sm:$0xff]   ;;  %v676_v11 = vld [vmem:[#allocation2 + $0x50] ss:$8 sps:$4 sm:$0xff]  }
  0x21   :  { %587 = vmatprep.subr.msk.bf16.mxu0 %vm84_vm0, %v79_v3  ;;  %342 = vmatprep.subr.bf16.mxu1 %v671_v7  ;;  %v677_v12 = vld [vmem:[#allocation2 + $0x44] ss:$8 sps:$4 sm:$0xff]   ;;  %v679_v13 = vld [vmem:[#allocation2 + $0x40] ss:$8 sps:$4 sm:$0xff]   ;;  %v680_v14 = vld [vmem:[#allocation2 + $0x34] ss:$8 sps:$4 sm:$0xff]  }
  0x22   :  { %106 = vmatpush1.bf16.msra.mxu0 %v86_v4  ;;  %v682_v15 = vld [vmem:[#allocation2 + $0x30] ss:$8 sps:$4 sm:$0xff]   ;;  %v683_v16 = vld [vmem:[#allocation2 + $0x24] ss:$8 sps:$4 sm:$0xff]   ;;  %v685_v17 = vld [vmem:[#allocation2 + $0x20] ss:$8 sps:$4 sm:$0xff]  }
  0x23   :  { %v686_v18 = vld [vmem:[#allocation2 + $0x14] ss:$8 sps:$4 sm:$0xff]   ;;  %v688_v19 = vld [vmem:[#allocation2 + $0x10] ss:$8 sps:$4 sm:$0xff]   ;;  %v689_v20 = vld [vmem:[#allocation2 + $0x4] ss:$8 sps:$4 sm:$0xff]  }
  0x24   :  { %343 = vmatpush1.bf16.msra.mxu1 %v673_v9  ;;  %v691_v21 = vld [vmem:[#allocation2] ss:$8 sps:$4 sm:$0xff]   ;;  %v692_v22 = vld [vmem:[#allocation2 + $0xf4] ss:$8 sps:$4 sm:$0xff]   ;;  %v694_v23 = vld [vmem:[#allocation2 + $0xf0] ss:$8 sps:$4 sm:$0xff]  }
  0x25   :  { %588 = vmatmul.mubr.msk.bf16.vlgmr.msra.gmra.mxu0 %vm80_vm1, %v57_v8  ;;  %344 = vmatprep.subr.bf16.mxu1 %v674_v10  ;;  %v695_v24 = vld [vmem:[#allocation2 + $0xe4] ss:$8 sps:$4 sm:$0xff]   ;;  %v697_v25 = vld [vmem:[#allocation2 + $0xe0] ss:$8 sps:$4 sm:$0xff]   ;;  %v698_v26 = vld [vmem:[#allocation2 + $0xd4] ss:$8 sps:$4 sm:$0xff]  }
  0x26   :  { %v700_v27 = vld [vmem:[#allocation2 + $0xd0] ss:$8 sps:$4 sm:$0xff]   ;;  %v701_v28 = vld [vmem:[#allocation2 + $0xc4] ss:$8 sps:$4 sm:$0xff]   ;;  %v703_v29 = vld [vmem:[#allocation2 + $0xc0] ss:$8 sps:$4 sm:$0xff]  }
  0x27   :  { %v704_v30 = vld [vmem:[#allocation2 + $0xb4] ss:$8 sps:$4 sm:$0xff]   ;;  %v706_v31 = vld [vmem:[#allocation2 + $0xb0] ss:$8 sps:$4 sm:$0xff]   ;;  %v707_v32 = vld [vmem:[#allocation2 + $0xa4] ss:$8 sps:$4 sm:$0xff]  }
  0x28   :  { %345 = vmatpush1.bf16.msra.mxu1 %v676_v11  ;;  %v709_v33 = vld [vmem:[#allocation2 + $0xa0] ss:$8 sps:$4 sm:$0xff]   ;;  %v710_v34 = vld [vmem:[#allocation2 + $0x94] ss:$8 sps:$4 sm:$0xff]   ;;  %v712_v35 = vld [vmem:[#allocation2 + $0x90] ss:$8 sps:$4 sm:$0xff]  }
  0x29   :  { %346 = vmatprep.subr.bf16.mxu1 %v677_v12  ;;  %v713_v36 = vld [vmem:[#allocation2 + $0x84] ss:$8 sps:$4 sm:$0xff]   ;;  %v715_v37 = vld [vmem:[#allocation2 + $0x80] ss:$8 sps:$4 sm:$0xff]   ;;  %v716_v38 = vld [vmem:[#allocation5 + $0x78] sm:$0xff]   ;;  %v63_v52 = vsub.s32 0, %v62_v51 }
  0x2a   :  { %v717_v39 = vld [vmem:[#allocation5 + $0x38] sm:$0xff]   ;;  %v718_v40 = vld [vmem:[#allocation5 + $0x70] sm:$0xff]   ;;  %638 = vmatprep.subr.bf16.mxu0 %v716_v38  ;;  %v720_v42 = vld [vmem:[#allocation5 + $0x68] sm:$0xff]   ;;  %v67_v54 = vsub.s32 1, %v62_v51 }
  0x2b   :  { %639 = vmatpush3.bf16.msra.mxu0 %v717_v39  ;;  %v719_v41 = vld [vmem:[#allocation5 + $0x30] sm:$0xff]   ;;  %v721_v43 = vld [vmem:[#allocation5 + $0x28] sm:$0xff]   ;;  %v722_v44 = vld [vmem:[#allocation5 + $0x60] sm:$0xff]  }
  0x2c   :  { %347 = vmatpush1.bf16.msra.mxu1 %v679_v13  ;;  %640 = vmatprep.subr.bf16.mxu0 %v718_v40  ;;  %v723_v45 = vld [vmem:[#allocation5 + $0x20] sm:$0xff]   ;;  %v724_v46 = vld [vmem:[#allocation5 + $0x58] sm:$0xff]   ;;  %v726_v48 = vld [vmem:[#allocation5 + $0x50] sm:$0xff]  }
  0x2d   :  { %348 = vmatprep.subr.bf16.mxu1 %v680_v14  ;;  %v725_v47 = vld [vmem:[#allocation5 + $0x18] sm:$0xff]   ;;  %v727_v49 = vld [vmem:[#allocation5 + $0x10] sm:$0xff]   ;;  %v59_v53 = vld [vmem:[%s876_s2] sm:$0x3] }
  0x2e   :  { %v64_v55 = vrot.slane %v59_v53, %v63_v52  ;;  %v68_v56 = vrot.slane %v59_v53, %v67_v54  ;;  %v728_v3 = vld [vmem:[#allocation5 + $0x48] sm:$0xff]   ;;  %v730_v5 = vld [vmem:[#allocation5 + $0x40] sm:$0xff]  }
  0x2f   :  { %641 = vmatpush3.bf16.msra.mxu0 %v719_v41  ;;  %v729_v4 = vld [vmem:[#allocation5 + $0x8] sm:$0xff]   ;;  %v731_v6 = vld [vmem:[#allocation5] sm:$0xff]  }
  0x30   :  { %349 = vmatpush1.bf16.msra.mxu1 %v682_v15  ;;  %642 = vmatprep.subr.bf16.mxu0 %v720_v42  ;;  %v168_v7 = vld [vmem:[%s878_s4] sm:$0x3]  ;;  %s809_s4 = smov [#allocation7]  }
  0x31   :  { %350 = vmatprep.subr.bf16.mxu1 %v683_v16  ;;  %v173_v8 = vrot.slane %v168_v7, %v63_v52  ;;  %v177_v9 = vrot.slane %v168_v7, %v67_v54  ;;  %s576_s20 = sshll.u32 %s809_s4, 4  ;;  %s577_s20 = int_to_ptr.vmem [resolvable:$true] %s576_s20 }
  0x32   :  { %p781_p11 = scmp.lt.s32.totalorder %s577_s20, %s577_s20 }
  0x33   :  { %643 = vmatpush3.bf16.msra.mxu0 %v721_v43 }
  0x34   :  { %351 = vmatpush1.bf16.msra.mxu1 %v685_v17  ;;  %644 = vmatprep.subr.bf16.mxu0 %v722_v44 }
  0x35   :  { %352 = vmatprep.subr.bf16.mxu1 %v686_v18 }
  0x37   :  { %645 = vmatpush3.bf16.msra.mxu0 %v723_v45 }
  0x38   :  { %353 = vmatpush1.bf16.msra.mxu1 %v688_v19  ;;  %646 = vmatprep.subr.bf16.mxu0 %v724_v46 }
  0x39   :  { %354 = vmatprep.subr.bf16.mxu1 %v689_v20 }
  0x3b   :  { %647 = vmatpush3.bf16.msra.mxu0 %v725_v47 }
  0x3c   :  { %355 = vmatpush1.bf16.msra.mxu1 %v691_v21  ;;  %648 = vmatprep.subr.bf16.mxu0 %v726_v48 }
  0x3d   :  { %356 = vmatprep.subr.bf16.mxu1 %v692_v22  ;;  %v621_v22 = vld [vmem:[%s880_s6] ss:$0 sm:$0xff]  ;;  %s776_s6 = scalar_lea.vmem %s577_s20, 128 }
  0x3e   :  { %p777_p10 = scmp.ne.s32.totalorder %s577_s20, %s776_s6  ;;  %p782_p12 = scmp.lt.s32.totalorder %s776_s6, %s776_s6 }
  0x3f   :  { %649 = vmatpush3.bf16.msra.mxu0 %v727_v49 }
  0x40   :  { %357 = vmatpush2.bf16.msra.mxu1 %v694_v23  ;;  %650 = vmatprep.subr.bf16.mxu0 %v728_v3  ;;  %p783_p13 = por %p782_p12, %p781_p11 }
  0x41   :  { %358 = vmatprep.subr.bf16.mxu1 %v695_v24 }
  0x42   :  { %p784_p0 = pnand %p783_p13, %p777_p10 }
  0x43   :  { %651 = vmatpush3.bf16.msra.mxu0 %v729_v4 }
  0x44   :  { %359 = vmatpush2.bf16.msra.mxu1 %v697_v25  ;;  %652 = vmatprep.subr.bf16.mxu0 %v730_v5 }
  0x45   :  { %360 = vmatprep.subr.bf16.mxu1 %v698_v26 }
  0x47   :  { %653 = vmatpush3.bf16.msra.mxu0 %v731_v6 }
  0x48   :  { %361 = vmatpush2.bf16.msra.mxu1 %v700_v27 }
  0x49   :  { %362 = vmatprep.subr.bf16.mxu1 %v701_v28 }
  0x4c   :  { %363 = vmatpush2.bf16.msra.mxu1 %v703_v29 }
  0x4d   :  { %364 = vmatprep.subr.bf16.mxu1 %v704_v30 }
  0x50   :  { %365 = vmatpush2.bf16.msra.mxu1 %v706_v31 }
  0x51   :  { %366 = vmatprep.subr.bf16.mxu1 %v707_v32 }
  0x54   :  { %367 = vmatpush2.bf16.msra.mxu1 %v709_v33 }
  0x55   :  { %368 = vmatprep.subr.bf16.mxu1 %v710_v34 }
  0x58   :  { %369 = vmatpush2.bf16.msra.mxu1 %v712_v35 }
  0x59   :  { %370 = vmatprep.subr.bf16.mxu1 %v713_v36 }
  0x5c   :  { %371 = vmatpush2.bf16.msra.mxu1 %v715_v37 }
  0xe5   :  { %v125_v57 = vpop.f32.mrf.mxu0 }
  0xe6   :  { %v126_v58 = vadd.f32 %v125_v57, %v64_v55 }
  0xe7   :  { %v127_v59 = vpop.f32.mrf.mxu0 }
  0xe8   :  { %v128_v60 = vadd.f32 %v127_v59, %v68_v56  ;;  %v132_v61 = vmax.f32 %v126_v58, 0.0 }
  0xe9   :  { %v129_v62 = vpop.f32.mrf.mxu0 }
  0xea   :  { %v133_v63 = vmax.f32 %v128_v60, 0.0  ;;  %v134_v2 = vpack.c.bf16 %v132_v61, %v132_v61 }
  0xeb   :  { %v130_v0 = vpop.f32.mrf.mxu0 }
  0xec   :  { %v135_v1 = vpack.c.bf16 %v133_v63, %v133_v63 }
  0xee   :  { %372 = vmatprep.mubr.bf16.mxu1 %v135_v1 }
  0xef   :  { %373 = vmatmul.mubr.bf16.vlgmr.msra.gmra.mxu1 %v134_v2 }
 0x1af   :  { %v374_v10 = vpop.f32.mrf.mxu1 }
 0x1b0   :  { %v375_v11 = vadd.f32 %v374_v10, %v173_v8 }
 0x1b1   :  { %v376_v12 = vpop.f32.mrf.mxu1 }
 0x1b2   :  { %v377_v13 = vadd.f32 %v376_v12, %v177_v9  ;;  %v381_v14 = vmax.f32 %v375_v11, 0.0 }
 0x1b3   :  { %v378_v15 = vpop.f32.mrf.mxu1 }
 0x1b4   :  { %v382_v16 = vmax.f32 %v377_v13, 0.0  ;;  %v383_v19 = vpack.c.bf16 %v381_v14, %v381_v14 }
 0x1b5   :  { %v379_v17 = vpop.f32.mrf.mxu1 }
 0x1b6   :  { %v384_v18 = vpack.c.bf16 %v382_v16, %v382_v16 }
 0x1b8   :  { %552 = vmatprep.mubr.bf16.mxu0 %v384_v18 }
 0x1b9   :  { %553 = vmatmul.mubr.bf16.vlgmr.msra.gmra.mxu0 %v383_v19 }
 0x279   :  { %v654_v20 = vpop.f32.mrf.mxu0 }
 0x27b   :  { %v655_v21 = vpop.f32.mrf.mxu0 }
 0x27c   :  { %v656_v23 = vadd.f32 %v655_v21, %v654_v20 }
 0x27d   :  { %v657_v24 = vpop.f32.mrf.mxu0 }
 0x27e   :  { %v555_v25 = vadd.f32 %v656_v23, %v621_v22 }
 0x27f   :  { %v658_v26 = vpop.f32.mrf.mxu0 }
 0x280   :  { %560 = vmax.xlane.f32.xlu0 %v555_v25 }
 0x309   :  { %v561_v27 = vpop.xlane.xlu0 %560 }
 0x30a   :  { %v562_v28 = vsub.f32 %v555_v25, %v561_v27 }
 0x30c   :  { %v563_v29 = vmul.f32 1.442695, %v562_v28 }
 0x30e   :  { %732 = vpow2.f32 %v563_v29 }
 0x31b   :  { %v733_v30 = vpop.eup %732 }
 0x31c   :  { %565 = vadd.xlane.f32.xlu0 %v733_v30 }
 0x3a5   :  { %v566_v31 = vpop.xlane.xlu0 %565 }
 0x3a6   :  { %734 = vrcp.f32 %v566_v31 }
 0x3b3   :  { %v735_v32 = vpop.eup %734 }
 0x3b4   :  { %v568_v33 = vmul.f32 %v735_v32, %v733_v30 }
 0x3b6   :  { %569 = vst [vmem:[#allocation7] sm:$0xff] %v568_v33 }
 0x3b7   :  { %787 = shalt.err (!%p784_p0)
}
 0x3b8   :  { %579 = dma.vmem_to_hbm [thread:$0]  %s577_s20, 128, %s881_s7, [#allocation4]  }
 0x3b9   :  { %800 = dma.done.wait [#allocation4], 128  }
 0x3ba   :  { %801 = vsyncadd [#allocation4], 4294967168 }
 0x3bb   :  { %583 = vsyncpa [#allocation3], 1 }
 0x3bc   :  { %584 = vsyncpa [#allocation6], 1 }
 0x3bd   :  { %585 = vsyncpa [#allocation4], 1 }

</bundles_post_ra>
